<compile_context>
chip_gen: v5e
topology: v5e:2x2
jax: 0.10.0
libtpu: 0.0.40
codegen_flags: <defaults>
</compile_context>

<pallas_src>
import jax
import jax.numpy as jnp
from jax.experimental import pallas as pl
from jax.experimental.pallas import tpu as pltpu


def make_corr2d_kernel(kh, kw, slab_rows, wp):
    """Valid cross-correlation over a lane-dense (slab_rows, wp) slab.

    slab_rows = B * Hp (images stacked along sublanes), wp = padded width.
    Rolled taps wrap across padding / image boundaries only in rows/cols that
    the wrapper discards when slicing back to the (OH, OW) valid region.
    """

    def kernel(x_ref, w_ref, b_ref, o_ref):
        # x_ref: (slab_rows, wp) f32 in VMEM; w_ref: (kh*kw,) f32 in SMEM;
        # b_ref: (1,) f32 in SMEM; o_ref: (slab_rows, wp) f32 in VMEM.
        x = x_ref[...]                                   # single full-tile load
        acc = jnp.full(x.shape, b_ref[0], jnp.float32)   # fold bias into init
        for i in range(kh):
            if i == 0:
                xi = x
            else:  # sublane roll: xi[r, :] = x[r + i, :] (valid rows only)
                xi = pltpu.roll(x, shift=(slab_rows - i) % slab_rows, axis=0)
            for j in range(kw):
                if j == 0:
                    xij = xi
                else:  # lane roll: xij[:, c] = xi[:, c + j] (valid cols only)
                    xij = pltpu.roll(xi, shift=(wp - j) % wp, axis=1)
                acc = acc + w_ref[i * kw + j] * xij
        o_ref[...] = acc                                 # unmasked full-tile store

    return kernel


def conv2d_pallas(x, weight, bias):
    """x: (N, C, H, W) f32, weight: (KH, KW) f32, bias: (1,) f32
    -> (N, C, OH, OW) f32 with OH = H-KH+1, OW = W-KW+1.
    The same 2-D filter is applied independently to every (n, c) plane
    (matches the d2l corr2d module, where N = C = 1)."""
    n, c, h, w = x.shape
    kh, kw = weight.shape
    oh, ow = h - kh + 1, w - kw + 1
    b = n * c

    # Pad each image to a vreg-aligned tile: sublane multiple rows, 128 lanes.
    hp = max(8, ((h + 7) // 8) * 8)
    wp = max(128, ((w + 127) // 128) * 128)

    x3 = x.reshape(b, h, w).astype(jnp.float32)
    x_pad = jnp.pad(x3, ((0, 0), (0, hp - h), (0, wp - w)))
    slab = x_pad.reshape(b * hp, wp)                     # lane-dense input slab

    w_flat = weight.reshape(kh * kw).astype(jnp.float32)
    bias_f = bias.astype(jnp.float32)

    out_slab = pl.pallas_call(
        make_corr2d_kernel(kh, kw, b * hp, wp),
        out_shape=jax.ShapeDtypeStruct((b * hp, wp), jnp.float32),
        in_specs=[
            pl.BlockSpec(memory_space=pltpu.VMEM),   # full slab, no grid
            pl.BlockSpec(memory_space=pltpu.SMEM),   # flattened filter taps
            pl.BlockSpec(memory_space=pltpu.SMEM),   # scalar bias
        ],
        out_specs=pl.BlockSpec(memory_space=pltpu.VMEM),
    )(slab, w_flat, bias_f)

    out = out_slab.reshape(b, hp, wp)[:, :oh, :ow]       # drop padded rows/cols
    return out.reshape(n, c, oh, ow)


def conv2d_ref(x, weight, bias):
    """Pure-JAX reference: per-plane valid cross-correlation + bias."""
    n, c, h, w = x.shape
    kh, kw = weight.shape
    oh, ow = h - kh + 1, w - kw + 1
    out = jnp.zeros((n, c, oh, ow), jnp.float32)
    for i in range(kh):
        for j in range(kw):
            out = out + weight[i, j] * x[:, :, i:i + oh, j:j + ow]
    return out + bias[0]


if __name__ == "__main__":
    key = jax.random.PRNGKey(0)
    kx, kw_, kx2 = jax.random.split(key, 3)

    # Primary case: matches the module's x.reshape((1, 1, 6, 8)).
    x = jax.random.uniform(kx, (1, 1, 6, 8), dtype=jnp.float32)
    kernel_size = (1, 2)                                    # d2l edge-detector shape
    weight = jax.random.uniform(kw_, kernel_size, dtype=jnp.float32)
    bias = jnp.zeros((1,), dtype=jnp.float32)

    out = conv2d_pallas(x, weight, bias)
    out = jax.block_until_ready(out)
    ref = conv2d_ref(x, weight, bias)
    assert out.shape == (1, 1, 6, 7), out.shape
    assert jnp.allclose(out, ref, atol=1e-5, rtol=1e-5), "mismatch vs reference"

    # Batched case: many (N, C) planes folded into one pallas_call (perf path).
    xb = jax.random.uniform(kx2, (2, 3, 6, 8), dtype=jnp.float32)
    outb = jax.block_until_ready(conv2d_pallas(xb, weight, bias))
    refb = conv2d_ref(xb, weight, bias)
    assert outb.shape == (2, 3, 6, 7), outb.shape
    assert jnp.allclose(outb, refb, atol=1e-5, rtol=1e-5), "batched mismatch"

    print("KERNEL_OK")
</pallas_src>

<mosaic_0001>
module attributes {stable_mosaic.version = 11 : i64} {
  func.func @kernel(%arg0: memref<8x128xf32, #tpu.memory_space<vmem>>, %arg1: memref<2xf32, #tpu.memory_space<smem>>, %arg2: memref<1xf32, #tpu.memory_space<smem>>, %arg3: memref<8x128xf32, #tpu.memory_space<vmem>>) attributes {dimension_semantics = [], scalar_prefetch = 0 : i64, scratch_operands = 0 : i64, tpu.core_type = #tpu.core_type<tc>} {
    %c0 = arith.constant 0 : index
    %c0_0 = arith.constant 0 : index
    %0 = vector.load %arg0[%c0, %c0_0] : memref<8x128xf32, #tpu.memory_space<vmem>>, vector<8x128xf32>
    %c0_1 = arith.constant 0 : index
    %1 = memref.load %arg2[%c0_1] : memref<1xf32, #tpu.memory_space<smem>>
    %2 = vector.broadcast %1 : f32 to vector<8x128xf32>
    %c0_2 = arith.constant 0 : index
    %3 = memref.load %arg1[%c0_2] : memref<2xf32, #tpu.memory_space<smem>>
    %4 = vector.broadcast %3 : f32 to vector<8x128xf32>
    %5 = arith.mulf %4, %0 : vector<8x128xf32>
    %6 = arith.addf %2, %5 : vector<8x128xf32>
    %c127_i32 = arith.constant 127 : i32
    %7 = tpu.dynamic_rotate %0 by %c127_i32 dim 1 : vector<8x128xf32>, i32 -> vector<8x128xf32>
    %c1 = arith.constant 1 : index
    %8 = memref.load %arg1[%c1] : memref<2xf32, #tpu.memory_space<smem>>
    %9 = vector.broadcast %8 : f32 to vector<8x128xf32>
    %10 = arith.mulf %9, %7 : vector<8x128xf32>
    %11 = arith.addf %6, %10 : vector<8x128xf32>
    %c0_3 = arith.constant 0 : index
    %c0_4 = arith.constant 0 : index
    %12 = vector.load %arg3[%c0_3, %c0_4] : memref<8x128xf32, #tpu.memory_space<vmem>>, vector<8x128xf32>
    tpu.vector_store %arg3[%c0_3, %c0_4], %11 {strides = array<i32>} : memref<8x128xf32, #tpu.memory_space<vmem>>, vector<8x128xf32>,
    return
  }
}

</mosaic_0001>

<bundles_post_ra>
// kernel: tpu_custom_call.1
= control target key start
LH: loop header
LB: loop body
LE: loop exit
PB: predicated region body
PF: predicated region fallthrough
CT: control target
= control target key end

     0   :  { %9 = vsyncpa [#allocation4], 0  ;;  %s182_s0 = inlined_call_operand.hbm [shape: f32[8,128], index: 0, kind: input, shape index: {}]   ;;  %s183_s1 = inlined_call_operand.vmem [shape: f32[2], index: 1, kind: input, shape index: {}]   ;;  %s184_s2 = inlined_call_operand.<no memory space> [shape: f32[1], index: 2, kind: input, shape index: {}]   ;;  %s185_s3 = inlined_call_operand.hbm [shape: f32[8,128], index: 3, kind: output, shape index: {}]  }
   0x1   :  { %10 = vsyncpa [#allocation6], 0 }
   0x2   :  { %11 = vsyncpa [#allocation5], 0  ;;  %s17_s14 = sshll.u32 %s182_s0, 4  ;;  %s146_s15 = smov [#allocation3]   ;;  %s18_s14 = int_to_ptr.hbm [resolvable:$true] %s17_s14 }
   0x3   :  { %s19_s16 = sshll.u32 %s146_s15, 4  ;;  %s28_s19 = sshll.u32 %s183_s1, 4  ;;  %s20_s16 = int_to_ptr.vmem [resolvable:$true] %s19_s16  ;;  %s29_s19 = int_to_ptr.vmem [resolvable:$true] %s28_s19 }
   0x4   :  { %22 = dma.hbm_to_vmem [thread:$0]  %s18_s14, 128, %s20_s16, [#allocation4]  }
   0x5   :  { %s147_s20 = smov [#allocation7]  }
   0x6   :  { %31 = dma.vmem_to_smem %s29_s19, 16, %s147_s20, [#allocation6]  }
   0x7   :  { %140 = dma.done.wait [#allocation4], 128  }
   0x8   :  { %141 = vsyncadd [#allocation4], 4294967168 }
   0x9   :  { %142 = dma.done.wait [#allocation6], 16  }
   0xa   :  { %143 = vsyncadd [#allocation6], 4294967280 }
   0xb   :  { %42 = sfence }
   0xc   :  { %v43_v0 = vld [vmem:[#allocation3] sm:$0xff]  ;;  %s148_s21 = smov 127   ;;  %s46_s0 = sld [smem:[#allocation7]]  ;;  %v45_v3 = vstv %s184_s2 }
   0xd   :  { %50 = vrot.lane.b32.xlu0 %v43_v0, %s148_s21  ;;  %s75_s22 = sld [smem:[#allocation7 + $0x1]]  ;;  %s149_s1 = smov [#allocation8]  }
   0xe   :  { %s62_s25 = sshll.u32 %s149_s1, 4  ;;  %s64_s28 = sshll.u32 %s185_s3, 4  ;;  %s63_s25 = int_to_ptr.vmem [resolvable:$true] %s62_s25  ;;  %s65_s28 = int_to_ptr.hbm [resolvable:$true] %s64_s28 }
  0x12   :  { %v47_v1 = vstv %s46_s0 }
  0x13   :  { %v48_v2 = vmul.f32 %v47_v1, %v43_v0  ;;  %v53_v4 = vstv %s75_s22 }
  0x15   :  { %v49_v5 = vadd.f32 %v48_v2, %v45_v3 }
  0x7f   :  { %v51_v6 = vpop.permute.xlu0 %50 }
  0x80   :  { %v54_v7 = vmul.f32 %v53_v4, %v51_v6 }
  0x82   :  { %v55_v8 = vadd.f32 %v54_v7, %v49_v5 }
  0x84   :  { %56 = vst [vmem:[#allocation8] sm:$0xff] %v55_v8 }
  0x85   :  { %67 = dma.vmem_to_hbm [thread:$0]  %s63_s25, 128, %s65_s28, [#allocation5]  }
  0x86   :  { %144 = dma.done.wait [#allocation5], 128  }
  0x87   :  { %145 = vsyncadd [#allocation5], 4294967168 }
  0x88   :  { %72 = vsyncpa [#allocation4], 1 }
  0x89   :  { %73 = vsyncpa [#allocation5], 1 }
  0x8a   :  { %74 = vsyncpa [#allocation6], 1 }

</bundles_post_ra>
